<compile_context>
chip_gen: v6e
topology: v6e:2x2x1
jax: 0.10.0
libtpu: 0.0.40
codegen_flags: <defaults>
</compile_context>

<pallas_src>
import functools
import math

import jax
import jax.numpy as jnp
from jax.experimental import pallas as pl
from jax.experimental.pallas import tpu as pltpu

_LOG2E = math.log2(math.e)
_MASK_FILL = -10000.0


def _attn_kernel(*refs, scale2, mm_dtype, has_mask, return_attns, lane_dense):
    it = iter(refs)
    q_ref, k_ref, v_ref = next(it), next(it), next(it)
    m_ref = next(it) if has_mask else None
    ctx_ref = next(it)
    attn_ref = next(it) if return_attns else None

    G = q_ref.shape[0]

    # Fold softmax scale * log2(e) into Q: G*tq*Dk multiplies instead of
    # G*tq*Sk, and exp() becomes a bare exp2() on the EUP.
    q = (q_ref[...] * scale2).astype(mm_dtype)            # (G, tq, Dk)
    k = k_ref[...].astype(mm_dtype)                        # (G, Sk, Dk)

    # Q @ K^T without materializing a transpose of K: contract the Dk axes.
    scores = jnp.einsum('gqd,gkd->gqk', q, k,
                        preferred_element_type=jnp.float32)  # (G, tq, Sk) f32

    if has_mask:
        # Fill value scaled to the base-2 domain -> identical softmax result.
        scores = jnp.where(m_ref[...] != 0,
                           jnp.float32(_MASK_FILL * _LOG2E), scores)

    # Numerically stable softmax over the key axis (base-2 exponent).
    m = jnp.max(scores, axis=-1, keepdims=True)
    e = jnp.exp2(scores - m)                               # EUP slot
    denom = jnp.sum(e, axis=-1, keepdims=True)
    r = pl.reciprocal(denom, approx=True)                  # EUP slot
    r = r * (2.0 - denom * r)                              # Newton -> ~f32
    attns = e * r

    # Single cast of the largest intermediate; reused for the store when the
    # attns output dtype matches the MXU dtype.
    attns_mm = attns.astype(mm_dtype)
    if return_attns:
        if jnp.dtype(attn_ref.dtype) == jnp.dtype(mm_dtype):
            attn_ref[...] = attns_mm
        else:
            attn_ref[...] = attns.astype(attn_ref.dtype)

    v = v_ref[...].astype(mm_dtype)                        # (G, Sk, Dv)
    ctx = jnp.einsum('gqk,gkd->gqd', attns_mm, v,
                     preferred_element_type=jnp.float32)   # (G, tq, Dv) f32

    if lane_dense:
        # Pack the G heads side by side along lanes -> dense (unmasked) stores
        # even when Dv < 128.  The wrapper undoes the packing.
        slab = jnp.concatenate([ctx[g] for g in range(G)], axis=-1)
        ctx_ref[...] = slab.reshape(ctx_ref.shape).astype(ctx_ref.dtype)
    else:
        ctx_ref[...] = ctx.astype(ctx_ref.dtype)


def _working_set_bytes(g, tq, Sk, Dk, Dv, in_it, mm_it, mask_it, attn_it,
                       return_attns):
    """Per-step VMEM footprint: 2x double-buffered blocks + in-kernel temps."""
    blocks = (g * tq * Dk * in_it            # Q block
              + g * Sk * Dk * in_it          # K block
              + g * Sk * Dv * in_it          # V block
              + g * tq * Sk * mask_it        # mask block
              + g * tq * Dv * in_it)         # ctx output block
    if return_attns:
        blocks += g * tq * Sk * attn_it      # attns output block
    inter = g * tq * Sk * (4 + 4 + mm_it)    # f32 scores + f32 exp + mm attns
    inter += g * (tq * Dk + Sk * Dk + Sk * Dv) * mm_it  # mm-dtype q/k/v casts
    inter += g * tq * Dv * 4                 # f32 context accumulator
    return 2 * blocks + inter


def _pick_tiles(BH, Sq, Sk, Dk, Dv, in_it, mm_it, mask_it, attn_it,
                return_attns, budget_bytes, num_tensorcores):
    """Pick (G heads / step, tq query rows / step) under the VMEM budget."""
    tq_cands = [Sq] + [c for c in (1024, 512, 256, 128, 64, 32, 16, 8)
                       if c < Sq and Sq % c == 0]

    def ws(g, tq):
        return _working_set_bytes(g, tq, Sk, Dk, Dv, in_it, mm_it, mask_it,
                                  attn_it, return_attns)

    for tq in tq_cands:
        for g in range(BH, 0, -1):
            if BH % g:
                continue
            if (num_tensorcores > 1 and BH >= num_tensorcores
                    and BH // g < num_tensorcores):
                # Keep >=1 grid step per TensorCore on multi-TC chips (v7x).
                continue
            if ws(g, tq) <= budget_bytes:
                return g, tq, ws(g, tq)
    # Even G=1 with the smallest Q tile exceeds the budget (very long Sk).
    # TODO(synk): key-tiled online-softmax path for long-context Sk.
    g, tq = 1, tq_cands[-1]
    return g, tq, ws(g, tq)


def _tpu_vmem_capacity_bytes():
    try:
        return int(pltpu.get_tpu_info().vmem_capacity_bytes)
    except Exception:
        return 64 << 20   # conservative fallback: v7x per-TensorCore VMEM


def _num_tensorcores():
    try:
        kind = jax.devices()[0].device_kind.lower()
    except Exception:
        return 1
    return 2 if "v7" in kind else 1   # v5e/v6e expose 1 TC per device


def scaled_dot_attention(Q, K, V, d_k, attn_mask=None, *,
                         matmul_dtype=jnp.bfloat16, attn_dtype=None,
                         return_attns=True, lane_dense_ctx=False,
                         vmem_budget_bytes=None):
    """Pallas implementation of ScaledDotAttention.forward (dropout p=0.0).

    Q: [BH, Sq, Dk], K: [BH, Sk, Dk], V: [BH, Sk, Dv]
    attn_mask: optional [BH, Sq, Sk]; True / nonzero == masked (bool/int/float
               accepted; anything not already int8/uint8 is compared against 0
               and cast once -- pass int8 to skip that extra HBM pass).
    matmul_dtype: MXU input dtype (accumulation is always f32). bf16 default
                  matches the native MXU dtype on v5e/v6e/v7x; pass
                  jnp.float32 for bit-accurate scores.
    attn_dtype:   dtype of the returned attns (default Q.dtype to match the
                  reference; bfloat16 halves the dominant HBM writeback).
    return_attns: False skips the [BH, Sq, Sk] attns output entirely
                  (flash-style); returns (context, None).
    lane_dense_ctx: pack the per-step head contexts into a lane-dense
                  [tq, G*Dv] slab (unmasked stores when Dv < 128), undone in
                  the wrapper.
    Returns (context [BH, Sq, Dv], attns [BH, Sq, Sk] or None).
    """
    BH, Sq, Dk = Q.shape
    _, Sk, _ = K.shape
    Dv = V.shape[-1]
    scale2 = (1.0 / math.sqrt(d_k)) * _LOG2E

    mm_dtype = jnp.dtype(matmul_dtype) if matmul_dtype is not None else jnp.dtype(Q.dtype)
    attn_dtype = jnp.dtype(attn_dtype) if attn_dtype is not None else jnp.dtype(Q.dtype)
    has_mask = attn_mask is not None

    # Mask travels as int8 (1 byte/elt); `!= 0` avoids truncating float masks.
    mask_in = None
    if has_mask:
        md = jnp.dtype(attn_mask.dtype)
        if md == jnp.dtype(jnp.int8) or md == jnp.dtype(jnp.uint8):
            mask_in = attn_mask
        else:
            mask_in = (attn_mask != 0).astype(jnp.int8)

    vmem_cap = _tpu_vmem_capacity_bytes()
    if vmem_budget_bytes is None:
        # ~24 MiB on 128 MiB-VMEM chips (v5e/v6e), ~16 MiB on v7x (64 MiB).
        vmem_budget_bytes = max(8 << 20, min(24 << 20, vmem_cap // 4))

    in_it = jnp.dtype(Q.dtype).itemsize
    G, tq, needed_bytes = _pick_tiles(
        BH, Sq, Sk, Dk, Dv, in_it, mm_dtype.itemsize,
        1 if has_mask else 0, attn_dtype.itemsize,
        return_attns, vmem_budget_bytes, _num_tensorcores())

    grid = (BH // G, Sq // tq)

    kernel = functools.partial(
        _attn_kernel, scale2=scale2, mm_dtype=mm_dtype, has_mask=has_mask,
        return_attns=return_attns, lane_dense=lane_dense_ctx)

    in_specs = [
        pl.BlockSpec((G, tq, Dk), lambda i, j: (i, j, 0)),   # Q tile
        pl.BlockSpec((G, Sk, Dk), lambda i, j: (i, 0, 0)),   # K (resident per i)
        pl.BlockSpec((G, Sk, Dv), lambda i, j: (i, 0, 0)),   # V (resident per i)
    ]
    inputs = [Q, K, V]
    if has_mask:
        in_specs.append(pl.BlockSpec((G, tq, Sk), lambda i, j: (i, j, 0)))
        inputs.append(mask_in)

    if lane_dense_ctx:
        ctx_shape = jax.ShapeDtypeStruct((BH // G, Sq, G * Dv), Q.dtype)
        ctx_spec = pl.BlockSpec((1, tq, G * Dv), lambda i, j: (i, j, 0))
    else:
        ctx_shape = jax.ShapeDtypeStruct((BH, Sq, Dv), Q.dtype)
        ctx_spec = pl.BlockSpec((G, tq, Dv), lambda i, j: (i, j, 0))

    out_shape = [ctx_shape]
    out_specs = [ctx_spec]
    if return_attns:
        out_shape.append(jax.ShapeDtypeStruct((BH, Sq, Sk), attn_dtype))
        out_specs.append(pl.BlockSpec((G, tq, Sk), lambda i, j: (i, j, 0)))

    # Always pass an explicit scoped-VMEM limit derived from the real working
    # set (blocks x2 + f32/mm-dtype intermediates), capped below physical VMEM.
    vmem_limit = int(min(max(needed_bytes + (4 << 20), 32 << 20),
                         int(0.75 * vmem_cap)))

    # Only the BH axis is "parallel": on v7x's 2 TensorCores this shards heads
    # while keeping per-core K/V residency across consecutive Q-row tiles.
    compiler_params = pltpu.CompilerParams(
        dimension_semantics=("parallel", "arbitrary"),
        vmem_limit_bytes=vmem_limit,
    )

    mask_bytes = mask_in.size * jnp.dtype(mask_in.dtype).itemsize if has_mask else 0
    attn_bytes = BH * Sq * Sk * attn_dtype.itemsize if return_attns else 0
    cost = pl.CostEstimate(
        flops=2 * BH * Sq * Sk * (Dk + Dv),
        transcendentals=BH * Sq * Sk,
        bytes_accessed=(Q.size + K.size + V.size) * in_it
                       + BH * Sq * Dv * in_it + mask_bytes + attn_bytes)

    outs = pl.pallas_call(
        kernel,
        out_shape=out_shape,
        grid=grid,
        in_specs=in_specs,
        out_specs=out_specs,
        compiler_params=compiler_params,
        cost_estimate=cost,
    )(*inputs)

    ctx = outs[0]
    if lane_dense_ctx:
        # Undo the lane packing (layout plumbing over ctx only, not attns).
        ctx = jnp.swapaxes(ctx.reshape(BH // G, Sq, G, Dv), 1, 2).reshape(BH, Sq, Dv)
    attns = outs[1] if return_attns else None
    return ctx, attns


def _reference(Q, K, V, d_k, attn_mask=None):
    scores = jnp.einsum('bqd,bkd->bqk', Q, K,
                        precision=jax.lax.Precision.HIGHEST) / math.sqrt(d_k)
    if attn_mask is not None:
        scores = jnp.where(attn_mask, -10000.0, scores)
    attns = jax.nn.softmax(scores, axis=-1)
    context = jnp.einsum('bqk,bkd->bqd', attns, V,
                         precision=jax.lax.Precision.HIGHEST)
    return context, attns


if __name__ == "__main__":
    key = jax.random.PRNGKey(0)
    kq, kk, kv, km = jax.random.split(key, 4)

    # batch=2, heads=2 -> BH=4, seq=8, d_k=d_v=32.
    B, H, S, Dk, Dv = 2, 2, 8, 32, 32
    BH = B * H
    d_k = Dk

    Q = jax.random.normal(kq, (BH, S, Dk), dtype=jnp.float32)
    K = jax.random.normal(kk, (BH, S, Dk), dtype=jnp.float32)
    V = jax.random.normal(kv, (BH, S, Dv), dtype=jnp.float32)
    mask = jax.random.bernoulli(km, p=0.25, shape=(BH, S, S))
    mask = mask.at[:, :, 0].set(False)          # never mask a whole row

    ctx_ref, attns_ref = _reference(Q, K, V, d_k, mask)
    ctx_ref_nm, attns_ref_nm = _reference(Q, K, V, d_k, None)

    # --- 1) f32 MXU path: tight check of the whole fused pipeline ---
    ctx, attns = scaled_dot_attention(Q, K, V, d_k, attn_mask=mask,
                                      matmul_dtype=jnp.float32)
    jax.block_until_ready((ctx, attns))
    assert jnp.allclose(ctx, ctx_ref, atol=1e-4, rtol=1e-4)
    assert jnp.allclose(attns, attns_ref, atol=3e-5, rtol=1e-4)

    # --- 2) f32, no mask ---
    ctx2, attns2 = scaled_dot_attention(Q, K, V, d_k, matmul_dtype=jnp.float32)
    jax.block_until_ready((ctx2, attns2))
    assert jnp.allclose(ctx2, ctx_ref_nm, atol=1e-4, rtol=1e-4)
    assert jnp.allclose(attns2, attns_ref_nm, atol=3e-5, rtol=1e-4)

    # --- 3) float-valued mask behaves like the bool mask (no truncation) ---
    ctxf, attnsf = scaled_dot_attention(Q, K, V, d_k,
                                        attn_mask=mask.astype(jnp.float32),
                                        matmul_dtype=jnp.float32)
    jax.block_until_ready((ctxf, attnsf))
    assert jnp.allclose(ctxf, ctx_ref, atol=1e-4, rtol=1e-4)

    # --- 4) default path: bf16 MXU inputs, f32 accumulation ---
    ctx_bf, attns_bf = scaled_dot_attention(Q, K, V, d_k, attn_mask=mask)
    jax.block_until_ready((ctx_bf, attns_bf))
    assert jnp.allclose(ctx_bf, ctx_ref, atol=1e-1, rtol=1e-1)
    assert jnp.allclose(attns_bf, attns_ref, atol=1e-1, rtol=1e-1)

    # --- 5) flash-style: skip the attns writeback entirely ---
    ctx_only, no_attns = scaled_dot_attention(Q, K, V, d_k, attn_mask=mask,
                                              return_attns=False)
    ctx_only = jax.block_until_ready(ctx_only)
    assert no_attns is None
    assert jnp.allclose(ctx_only, ctx_ref, atol=1e-1, rtol=1e-1)

    # --- 6) bf16 attns output + lane-dense ctx packing ---
    ctx_ld, attns_b16 = scaled_dot_attention(Q, K, V, d_k, attn_mask=mask,
                                             attn_dtype=jnp.bfloat16,
                                             lane_dense_ctx=True)
    jax.block_until_ready((ctx_ld, attns_b16))
    assert attns_b16.dtype == jnp.bfloat16
    assert jnp.allclose(ctx_ld, ctx_ref, atol=1e-1, rtol=1e-1)
    assert jnp.allclose(attns_b16.astype(jnp.float32), attns_ref,
                        atol=1e-1, rtol=1e-1)

    print("KERNEL_OK")
</pallas_src>

<mosaic_0001>
module attributes {stable_mosaic.version = 11 : i64} {
  func.func @_attn_kernel(%arg0: i32, %arg1: i32, %arg2: memref<4x8x32xf32, #tpu.memory_space<vmem>>, %arg3: memref<4x8x32xf32, #tpu.memory_space<vmem>>, %arg4: memref<4x8x32xf32, #tpu.memory_space<vmem>>, %arg5: memref<4x8x8xi8, #tpu.memory_space<vmem>>, %arg6: memref<4x8x32xf32, #tpu.memory_space<vmem>>, %arg7: memref<4x8x8xf32, #tpu.memory_space<vmem>>) attributes {dimension_semantics = [#tpu.dimension_semantics<parallel>, #tpu.dimension_semantics<arbitrary>], iteration_bounds = array<i64: 1, 1>, scalar_prefetch = 0 : i64, scratch_operands = 0 : i64, tpu.core_type = #tpu.core_type<tc>, window_params = [{transform_indices = @transform_0, window_bounds = array<i64: 4, 8, 32>}, {transform_indices = @transform_1, window_bounds = array<i64: 4, 8, 32>}, {transform_indices = @transform_2, window_bounds = array<i64: 4, 8, 32>}, {transform_indices = @transform_3, window_bounds = array<i64: 4, 8, 8>}, {transform_indices = @transform_4, window_bounds = array<i64: 4, 8, 32>}, {transform_indices = @transform_5, window_bounds = array<i64: 4, 8, 8>}]} {
    %c0 = arith.constant 0 : index
    %c0_0 = arith.constant 0 : index
    %c0_1 = arith.constant 0 : index
    %0 = vector.load %arg2[%c0, %c0_0, %c0_1] : memref<4x8x32xf32, #tpu.memory_space<vmem>>, vector<4x8x32xf32>
    %cst = arith.constant 0.255034864 : f32
    %1 = vector.broadcast %cst : f32 to vector<4x8x32xf32>
    %2 = arith.mulf %0, %1 : vector<4x8x32xf32>
    %c0_2 = arith.constant 0 : index
    %c0_3 = arith.constant 0 : index
    %c0_4 = arith.constant 0 : index
    %3 = vector.load %arg3[%c0_2, %c0_3, %c0_4] : memref<4x8x32xf32, #tpu.memory_space<vmem>>, vector<4x8x32xf32>
    "tpu.trace_start"() <{level = 10 : i32, message = "gqd,gkd->gqk"}> : () -> ()
    %cst_5 = arith.constant dense<0.000000e+00> : vector<4x8x8xf32>
    %4 = tpu.matmul %2, %3, %cst_5 {dimension_numbers = #tpu.dot_dimension_numbers<[2], [2], [1], [1], [0, 0, 0, 1, 1, 1], [0], [0]>} : vector<4x8x32xf32>, vector<4x8x32xf32>, vector<4x8x8xf32> -> vector<4x8x8xf32>
    "tpu.trace_stop"() : () -> ()
    %c0_6 = arith.constant 0 : index
    %c0_7 = arith.constant 0 : index
    %c0_8 = arith.constant 0 : index
    %5 = vector.load %arg5[%c0_6, %c0_7, %c0_8] : memref<4x8x8xi8, #tpu.memory_space<vmem>>, vector<4x8x8xi8>
    %c0_i8 = arith.constant 0 : i8
    %6 = vector.broadcast %c0_i8 : i8 to vector<4x8x8xi8>
    %7 = arith.cmpi ne, %5, %6 : vector<4x8x8xi8>
    %cst_9 = arith.constant -14426.9502 : f32
    %8 = vector.broadcast %cst_9 : f32 to vector<4x8x8xf32>
    %9 = arith.select %7, %8, %4 : vector<4x8x8xi1>, vector<4x8x8xf32>
    %cst_10 = arith.constant dense<0xFF800000> : vector<4x8xf32>
    %10 = vector.multi_reduction <maximumf>, %9, %cst_10 [2] : vector<4x8x8xf32> to vector<4x8xf32>
    %11 = vector.shape_cast %10 : vector<4x8xf32> to vector<4x8x1xf32>
    %12 = vector.broadcast %11 : vector<4x8x1xf32> to vector<4x8x8xf32>
    %13 = arith.subf %9, %12 : vector<4x8x8xf32>
    %14 = math.exp2 %13 : vector<4x8x8xf32>
    %cst_11 = arith.constant dense<0.000000e+00> : vector<4x8xf32>
    %15 = vector.multi_reduction <add>, %14, %cst_11 [2] : vector<4x8x8xf32> to vector<4x8xf32>
    %16 = vector.shape_cast %15 : vector<4x8xf32> to vector<4x8x1xf32>
    %17 = tpu.reciprocal %16 {approx = true} : vector<4x8x1xf32> -> vector<4x8x1xf32>
    %18 = arith.mulf %16, %17 : vector<4x8x1xf32>
    %cst_12 = arith.constant 2.000000e+00 : f32
    %19 = vector.broadcast %cst_12 : f32 to vector<4x8x1xf32>
    %20 = arith.subf %19, %18 : vector<4x8x1xf32>
    %21 = arith.mulf %17, %20 : vector<4x8x1xf32>
    %22 = vector.broadcast %21 : vector<4x8x1xf32> to vector<4x8x8xf32>
    %23 = arith.mulf %14, %22 : vector<4x8x8xf32>
    %c0_13 = arith.constant 0 : index
    %c0_14 = arith.constant 0 : index
    %c0_15 = arith.constant 0 : index
    %24 = vector.load %arg7[%c0_13, %c0_14, %c0_15] : memref<4x8x8xf32, #tpu.memory_space<vmem>>, vector<4x8x8xf32>
    tpu.vector_store %arg7[%c0_13, %c0_14, %c0_15], %23 {strides = array<i32>} : memref<4x8x8xf32, #tpu.memory_space<vmem>>, vector<4x8x8xf32>,
    %c0_16 = arith.constant 0 : index
    %c0_17 = arith.constant 0 : index
    %c0_18 = arith.constant 0 : index
    %25 = vector.load %arg4[%c0_16, %c0_17, %c0_18] : memref<4x8x32xf32, #tpu.memory_space<vmem>>, vector<4x8x32xf32>
    "tpu.trace_start"() <{level = 10 : i32, message = "gqk,gkd->gqd"}> : () -> ()
    %cst_19 = arith.constant dense<0.000000e+00> : vector<4x8x32xf32>
    %26 = tpu.matmul %23, %25, %cst_19 {dimension_numbers = #tpu.dot_dimension_numbers<[2], [1], [1], [2], [0, 0, 0, 1, 1, 2], [0], [0]>} : vector<4x8x8xf32>, vector<4x8x32xf32>, vector<4x8x32xf32> -> vector<4x8x32xf32>
    "tpu.trace_stop"() : () -> ()
    %c0_20 = arith.constant 0 : index
    %c0_21 = arith.constant 0 : index
    %c0_22 = arith.constant 0 : index
    %27 = vector.load %arg6[%c0_20, %c0_21, %c0_22] : memref<4x8x32xf32, #tpu.memory_space<vmem>>, vector<4x8x32xf32>
    tpu.vector_store %arg6[%c0_20, %c0_21, %c0_22], %26 {strides = array<i32>} : memref<4x8x32xf32, #tpu.memory_space<vmem>>, vector<4x8x32xf32>,
    return
  }
  func.func @transform_0(%arg0: i32, %arg1: i32) -> (i32, i32, i32) {
    %c0_i32 = arith.constant 0 : i32
    %c0_i32_0 = arith.constant 0 : i32
    return %arg0, %arg1, %c0_i32 : i32, i32, i32
  }
  func.func @transform_1(%arg0: i32, %arg1: i32) -> (i32, i32, i32) {
    %c0_i32 = arith.constant 0 : i32
    %c0_i32_0 = arith.constant 0 : i32
    %c0_i32_1 = arith.constant 0 : i32
    return %arg0, %c0_i32, %c0_i32_0 : i32, i32, i32
  }
  func.func @transform_2(%arg0: i32, %arg1: i32) -> (i32, i32, i32) {
    %c0_i32 = arith.constant 0 : i32
    %c0_i32_0 = arith.constant 0 : i32
    %c0_i32_1 = arith.constant 0 : i32
    return %arg0, %c0_i32, %c0_i32_0 : i32, i32, i32
  }
  func.func @transform_3(%arg0: i32, %arg1: i32) -> (i32, i32, i32) {
    %c0_i32 = arith.constant 0 : i32
    %c0_i32_0 = arith.constant 0 : i32
    return %arg0, %arg1, %c0_i32 : i32, i32, i32
  }
  func.func @transform_4(%arg0: i32, %arg1: i32) -> (i32, i32, i32) {
    %c0_i32 = arith.constant 0 : i32
    %c0_i32_0 = arith.constant 0 : i32
    return %arg0, %arg1, %c0_i32 : i32, i32, i32
  }
  func.func @transform_5(%arg0: i32, %arg1: i32) -> (i32, i32, i32) {
    %c0_i32 = arith.constant 0 : i32
    %c0_i32_0 = arith.constant 0 : i32
    return %arg0, %arg1, %c0_i32 : i32, i32, i32
  }
}

</mosaic_0001>

<bundles_post_ra>
// kernel: tpu_custom_call.1
= control target key start
LH: loop header
LB: loop body
LE: loop exit
PB: predicated region body
PF: predicated region fallthrough
CT: control target
= control target key end

     0   :  { %11 = vsyncpa [#allocation3], 0  ;;  %s1166_s0 = inlined_call_operand.hbm [shape: f32[4,8,32], index: 0, kind: input, shape index: {}]   ;;  %s1167_s1 = inlined_call_operand.hbm [shape: f32[4,8,32], index: 1, kind: input, shape index: {}]   ;;  %s1168_s2 = inlined_call_operand.hbm [shape: f32[4,8,32], index: 2, kind: input, shape index: {}]   ;;  %s1169_s3 = inlined_call_operand.hbm [shape: s8[4,8,8], index: 3, kind: input, shape index: {}]   ;;  %s1170_s4 = inlined_call_operand.hbm [shape: f32[4,8,32], index: 4, kind: output, shape index: {0}]   ;;  %s1171_s5 = inlined_call_operand.hbm [shape: f32[4,8,8], index: 5, kind: output, shape index: {1}]  }
   0x1   :  { %12 = vsyncpa [#allocation6], 0 }
   0x2   :  { %13 = vsyncpa [#allocation9], 0 }
   0x3   :  { %14 = vsyncpa [#allocation4], 0 }
   0x4   :  { %15 = vsyncpa [#allocation12], 0  ;;  %s1038_s18 = smov [#allocation5]   ;;  %s1039_s20 = smov [#allocation2]  }
   0x5   :  { %s33_s19 = sshll.u32 %s1038_s18, 4  ;;  %s21_s21 = sshll.u32 %s1039_s20, 4  ;;  %s34_s19 = int_to_ptr.vmem [resolvable:$true] %s33_s19  ;;  %s22_s21 = int_to_ptr.vmem [resolvable:$true] %s21_s21 }
   0x6   :  { %s916_s22 = scalar_lea.vmem %s34_s19, 512  ;;  %p921_p1 = scmp.lt.s32.totalorder %s34_s19, %s34_s19 }
   0x7   :  { %p917_p0 = scmp.ne.s32.totalorder %s34_s19, %s916_s22  ;;  %p922_p2 = scmp.lt.s32.totalorder %s916_s22, %s916_s22 }
   0x9   :  { %p923_p3 = por %p922_p2, %p921_p1 }
   0xb   :  { %p924_p4 = pnand %p923_p3, %p917_p0 }
   0xd   :  { %927 = shalt.err (!%p924_p4)
}
   0xe   :  { %s1040_s23 = smov 128   ;;  %s1041_s24 = smov 8  }
   0xf   :  { %39 = dma.hbm_to_vmem [thread:$0]  %s1167_s1, 512, %s34_s19, [#allocation6], %s1040_s23, %s1040_s23, %s1041_s24  }
  0x10   :  { %s936_s27 = scalar_lea.vmem %s22_s21, 512  ;;  %p941_p6 = scmp.lt.s32.totalorder %s22_s21, %s22_s21 }
  0x11   :  { %p937_p5 = scmp.ne.s32.totalorder %s22_s21, %s936_s27  ;;  %p942_p7 = scmp.lt.s32.totalorder %s936_s27, %s936_s27 }
  0x13   :  { %p943_p8 = por %p942_p7, %p941_p6 }
  0x15   :  { %p944_p9 = pnand %p943_p8, %p937_p5 }
  0x17   :  { %947 = shalt.err (!%p944_p9)
}
  0x18   :  { %27 = dma.hbm_to_vmem [thread:$0]  %s1166_s0, 512, %s22_s21, [#allocation3], %s1040_s23, %s1040_s23, %s1041_s24  }
  0x19   :  { %s1042_s30 = smov [#allocation7]   ;;  %s1043_s7 = smov [#allocation8]  }
  0x1a   :  { %s45_s6 = sshll.u32 %s1042_s30, 4  ;;  %s57_s8 = sshll.u32 %s1043_s7, 4  ;;  %s46_s6 = int_to_ptr.vmem [resolvable:$true] %s45_s6  ;;  %s58_s8 = int_to_ptr.vmem [resolvable:$true] %s57_s8 }
  0x1b   :  { %s956_s1 = scalar_lea.vmem %s46_s6, 512  ;;  %p961_p11 = scmp.lt.s32.totalorder %s46_s6, %s46_s6 }
  0x1c   :  { %p957_p10 = scmp.ne.s32.totalorder %s46_s6, %s956_s1  ;;  %p962_p12 = scmp.lt.s32.totalorder %s956_s1, %s956_s1 }
  0x1e   :  { %p963_p13 = por %p962_p12, %p961_p11 }
  0x20   :  { %p964_p0 = pnand %p963_p13, %p957_p10 }
  0x22   :  { %967 = shalt.err (!%p964_p0)
}
  0x23   :  { %51 = dma.hbm_to_vmem [thread:$0]  %s1168_s2, 512, %s46_s6, [#allocation6], %s1040_s23, %s1040_s23, %s1041_s24  }
  0x24   :  { %s976_s0 = scalar_lea.vmem %s58_s8, 128  ;;  %p981_p2 = scmp.lt.s32.totalorder %s58_s8, %s58_s8 }
  0x25   :  { %p977_p1 = scmp.ne.s32.totalorder %s58_s8, %s976_s0  ;;  %p982_p3 = scmp.lt.s32.totalorder %s976_s0, %s976_s0 }
  0x27   :  { %p983_p4 = por %p982_p3, %p981_p2 }
  0x29   :  { %p984_p5 = pnand %p983_p4, %p977_p1 }
  0x2b   :  { %987 = shalt.err (!%p984_p5)
}
  0x2c   :  { %s1044_s11 = smov 32   ;;  %s1045_s12 = smov 2  }
  0x2d   :  { %63 = dma.hbm_to_vmem [thread:$0]  %s1169_s3, 128, %s58_s8, [#allocation9], %s1044_s11, %s1044_s11, %s1045_s12  }
  0x2e   :  { %1028 = dma.done.wait [#allocation3], 512  }
  0x2f   :  { %1029 = vsyncadd [#allocation3], 4294966784 }
  0x30   :  { %1030 = dma.done.wait [#allocation6], 1024  }
  0x31   :  { %1031 = vsyncadd [#allocation6], 4294966272 }
  0x32   :  { %1032 = dma.done.wait [#allocation9], 128  }
  0x33   :  { %1033 = vsyncadd [#allocation9], 4294967168  ;;  %v1046_v0 = vmov 0.0   ;;  %vm1047_vm0 = vmmov 0   ;;  %vm90_vm1 = vcmask 261120   ;;  %v86_v1 = vld [vmem:[#allocation5] sm:$0xff] }
  0x34   :  { %839 = vmatprep.subr.mxu0 %v1046_v0  ;;  %841 = vmatprep.mubr.msk.f32.mxu0 %vm1047_vm0, %v1046_v0  ;;  %v78_v2 = vld [vmem:[#allocation2] sm:$0xff]  ;;  %v87_v3 = vld [vmem:[#allocation5 + $0x8] sm:$0xff]  ;;  %v80_v6 = vld [vmem:[#allocation2 + $0x10] sm:$0xff]  ;;  %v1048_v17 = vmov 0   ;;  %vm419_vm8 = vcmask 64512   ;;  %s1049_s2 = smov [#allocation11]  }
  0x35   :  { %844 = vmatprep.subr.mxu1 %v1046_v0  ;;  %846 = vmatprep.mubr.msk.f32.mxu1 %vm1047_vm0, %v1046_v0  ;;  %v82_v4 = vmul.f32 0.25503486, %v78_v2  ;;  %v79_v5 = vld [vmem:[#allocation2 + $0x8] sm:$0xff]  ;;  %v88_v7 = vld [vmem:[#allocation5 + $0x10] sm:$0xff]  ;;  %v81_v9 = vld [vmem:[#allocation2 + $0x18] sm:$0xff]  ;;  %s793_s3 = sshll.u32 %s1049_s2, 4  ;;  %s794_s3 = int_to_ptr.vmem [resolvable:$true] %s793_s3 }
  0x36   :  { %840 = vmatpush3.xpose.msk.msra.mxu0 %vm90_vm1, %v86_v1  ;;  %845 = vmatpush3.xpose.msk.msra.mxu1 %vm90_vm1, %v87_v3  ;;  %v83_v8 = vmul.f32 0.25503486, %v79_v5  ;;  %v89_v10 = vld [vmem:[#allocation5 + $0x18] sm:$0xff]  ;;  %v84_v11 = vmul.f32 0.25503486, %v80_v6  ;;  %v476_v58 = vld [vmem:[#allocation7] sm:$0xff]  ;;  %p993_p7 = scmp.lt.s32.totalorder %s794_s3, %s794_s3 }
  0x37   :  { %849 = vmatprep.subr.mxu0 %v1046_v0  ;;  %854 = vmatprep.subr.mxu1 %v1046_v0  ;;  %v85_v12 = vmul.f32 0.25503486, %v81_v9  ;;  %v395_v13 = vld [vmem:[#allocation8] sm:$0x3]  ;;  %v396_v14 = vld [vmem:[#allocation8 + $0x2] sm:$0x3] }
  0x38   :  { %vm399_vm2 = vnez %v395_v13  ;;  %vm400_vm3 = vnez %v396_v14  ;;  %v397_v15 = vld [vmem:[#allocation8 + $0x4] sm:$0x3]  ;;  %v398_v16 = vld [vmem:[#allocation8 + $0x6] sm:$0x3]  ;;  %v477_v59 = vld [vmem:[#allocation7 + $0x8] sm:$0xff]  ;;  %s988_s15 = scalar_lea.vmem %s794_s3, 512 }
  0x39   :  { %842 = vmatmul.mubr.msk.f32.vlgmr.msra.gmra.mxu0 %vm90_vm1, %v82_v4  ;;  %847 = vmatmul.mubr.msk.f32.vlgmr.msra.gmra.mxu1 %vm90_vm1, %v83_v8  ;;  %v403_v18 = vsel %vm399_vm2, 16843009, %v1048_v17  ;;  %v404_v19 = vsel %vm400_vm3, 16843009, %v1048_v17  ;;  %vm401_vm4 = vnez %v397_v15  ;;  %vm402_vm5 = vnez %v398_v16  ;;  %p989_p6 = scmp.ne.s32.totalorder %s794_s3, %s988_s15  ;;  %p994_p8 = scmp.lt.s32.totalorder %s988_s15, %s988_s15 }
  0x3a   :  { %850 = vmatpush3.xpose.msk.msra.mxu0 %vm90_vm1, %v88_v7  ;;  %851 = vmatprep.mubr.msk.f32.mxu0 %vm1047_vm0, %v1046_v0  ;;  %v407_v20 = vunpack.c.0.s8 %v403_v18  ;;  %v408_v21 = vunpack.c.0.s8 %v404_v19  ;;  %v405_v22 = vsel %vm401_vm4, 16843009, %v1048_v17  ;;  %v406_v23 = vsel %vm402_vm5, 16843009, %v1048_v17  ;;  %v479_v19 = vld [vmem:[#allocation7 + $0x18] sm:$0xff] }
  0x3b   :  { %855 = vmatpush3.xpose.msk.msra.mxu1 %vm90_vm1, %v89_v10  ;;  %856 = vmatprep.mubr.msk.f32.mxu1 %vm1047_vm0, %v1046_v0  ;;  %v409_v24 = vunpack.c.0.s8 %v405_v22  ;;  %v410_v25 = vunpack.c.0.s8 %v406_v23  ;;  %p995_p9 = por %p994_p8, %p993_p7 }
  0x3c   :  { %859 = vmatprep.subr.mxu0 %v1046_v0  ;;  %864 = vmatprep.subr.mxu1 %v1046_v0  ;;  %vm411_vm6 = vcmp.ne.s32.totalorder %v407_v20, 0  ;;  %vm412_vm7 = vcmp.ne.s32.totalorder %v408_v21, 0 }
  0x3d   :  { %852 = vmatmul.mubr.msk.f32.vlgmr.msra.gmra.mxu0 %vm90_vm1, %v84_v11  ;;  %vm413_vm9 = vcmp.ne.s32.totalorder %v409_v24, 0  ;;  %vm414_vm10 = vcmp.ne.s32.totalorder %v410_v25, 0  ;;  %v478_v11 = vld [vmem:[#allocation7 + $0x10] sm:$0xff]  ;;  %p996_p10 = pnand %p995_p9, %p989_p6 }
  0x3e   :  { %857 = vmatmul.mubr.msk.f32.vlgmr.msra.gmra.mxu1 %vm90_vm1, %v85_v12  ;;  %861 = vmatprep.mubr.msk.f32.mxu0 %vm1047_vm0, %v1046_v0 }
  0x3f   :  { %866 = vmatprep.mubr.msk.f32.mxu1 %vm1047_vm0, %v1046_v0  ;;  %860 = vmatpush3.msra.mxu0 %v476_v58 }
  0x40   :  { %869 = vmatprep.subr.mxu0 %v1046_v0  ;;  %865 = vmatpush3.msra.mxu1 %v477_v59 }
  0x41   :  { %874 = vmatprep.subr.mxu1 %v1046_v0 }
  0xf9   :  { %v163_v26 = vpop.f32.mrf.mxu0  ;;  %v239_v27 = vpop.f32.mrf.mxu1 }
  0xfa   :  { %v415_v28 = vsel %vm411_vm6, -14426.95, %v163_v26  ;;  %v416_v29 = vsel %vm412_vm7, -14426.95, %v239_v27 }
  0xfb   :  { %v843_v30 = vpop.f32.mrf.mxu0  ;;  %v420_v31 = vsel %vm419_vm8, %v415_v28, -inf  ;;  %v848_v32 = vpop.f32.mrf.mxu1  ;;  %v423_v34 = vsel %vm419_vm8, %v416_v29, -inf }
  0xfc   :  { %421 = vmax.xlane.f32.xlu0 %v420_v31 }
  0xfd   :  { %v315_v33 = vpop.f32.mrf.mxu0 }
  0xfe   :  { %v417_v35 = vsel %vm413_vm9, -14426.95, %v315_v33  ;;  %v391_v36 = vpop.f32.mrf.mxu1 }
  0xff   :  { %v853_v37 = vpop.f32.mrf.mxu0  ;;  %v418_v38 = vsel %vm414_vm10, -14426.95, %v391_v36  ;;  %v426_v39 = vsel %vm419_vm8, %v417_v35, -inf }
 0x100   :  { %424 = vmax.xlane.f32.xlu0 %v423_v34  ;;  %427 = vmax.xlane.f32.xlu1 %v426_v39  ;;  %v858_v40 = vpop.f32.mrf.mxu1  ;;  %v429_v41 = vsel %vm419_vm8, %v418_v38, -inf }
 0x104   :  { %430 = vmax.xlane.f32.xlu1 %v429_v41 }
 0x185   :  { %v422_v42 = vpop.xlane.xlu0 %421 }
 0x186   :  { %v432_v43 = vsub.f32 %v415_v28, %v422_v42 }
 0x188   :  { %892 = vpow2.f32 %v432_v43 }
 0x189   :  { %v425_v44 = vpop.xlane.xlu0 %424  ;;  %v428_v45 = vpop.xlane.xlu1 %427 }
 0x18a   :  { %v433_v46 = vsub.f32 %v416_v29, %v425_v44  ;;  %v434_v47 = vsub.f32 %v417_v35, %v428_v45 }
 0x18c   :  { %894 = vpow2.f32 %v433_v46 }
 0x18d   :  { %896 = vpow2.f32 %v434_v47  ;;  %v431_v48 = vpop.xlane.xlu1 %430 }
 0x18e   :  { %v435_v49 = vsub.f32 %v418_v38, %v431_v48 }
 0x190   :  { %898 = vpow2.f32 %v435_v49 }
 0x195   :  { %v893_v50 = vpop.eup %892 }
 0x196   :  { %v440_v51 = vsel %vm419_vm8, %v893_v50, 0.0 }
 0x197   :  { %441 = vadd.xlane.f32.xlu0 %v440_v51 }
 0x199   :  { %v895_v52 = vpop.eup %894 }
 0x19a   :  { %v897_v53 = vpop.eup %896  ;;  %v443_v54 = vsel %vm419_vm8, %v895_v52, 0.0 }
 0x19b   :  { %444 = vadd.xlane.f32.xlu1 %v443_v54  ;;  %v446_v55 = vsel %vm419_vm8, %v897_v53, 0.0 }
 0x19c   :  { %447 = vadd.xlane.f32.xlu0 %v446_v55 }
 0x19d   :  { %v899_v56 = vpop.eup %898 }
 0x19e   :  { %v449_v57 = vsel %vm419_vm8, %v899_v56, 0.0 }
 0x19f   :  { %450 = vadd.xlane.f32.xlu1 %v449_v57 }
 0x220   :  { %v442_v60 = vpop.xlane.xlu0 %441 }
 0x221   :  { %900 = vrcp.f32 %v442_v60 }
 0x224   :  { %v445_v61 = vpop.xlane.xlu1 %444 }
 0x225   :  { %v448_v62 = vpop.xlane.xlu0 %447  ;;  %902 = vrcp.f32 %v445_v61 }
 0x226   :  { %904 = vrcp.f32 %v448_v62 }
 0x228   :  { %v451_v63 = vpop.xlane.xlu1 %450 }
 0x229   :  { %906 = vrcp.f32 %v451_v63 }
 0x22e   :  { %v901_v1 = vpop.eup %900 }
 0x22f   :  { %v456_v2 = vmul.f32 %v901_v1, %v442_v60 }
 0x231   :  { %v460_v3 = vsub.f32 2.0, %v456_v2 }
 0x232   :  { %v903_v4 = vpop.eup %902 }
 0x233   :  { %v905_v5 = vpop.eup %904  ;;  %v464_v6 = vmul.f32 %v901_v1, %v460_v3  ;;  %v457_v7 = vmul.f32 %v903_v4, %v445_v61 }
 0x234   :  { %v458_v8 = vmul.f32 %v905_v5, %v448_v62 }
 0x235   :  { %v468_v9 = vmul.f32 %v893_v50, %v464_v6  ;;  %v461_v10 = vsub.f32 2.0, %v457_v7 }
 0x236   :  { %v907_v12 = vpop.eup %906  ;;  %v462_v13 = vsub.f32 2.0, %v458_v8 }
 0x237   :  { %472 = vst.msk [vmem:[#allocation11] sm:$0xff] %vm419_vm8, %v468_v9  ;;  %v465_v14 = vmul.f32 %v903_v4, %v461_v10  ;;  %v459_v15 = vmul.f32 %v907_v12, %v451_v63  ;;  %862 = vmatmul.mubr.msk.f32.vlgmr.msra.gmra.mxu0 %vm419_vm8, %v468_v9 }
 0x238   :  { %v466_v16 = vmul.f32 %v905_v5, %v462_v13  ;;  %870 = vmatpush3.msra.mxu0 %v478_v11  ;;  %871 = vmatprep.mubr.msk.f32.mxu0 %vm1047_vm0, %v1046_v0 }
 0x239   :  { %v469_v17 = vmul.f32 %v895_v52, %v465_v14  ;;  %v463_v18 = vsub.f32 2.0, %v459_v15 }
 0x23a   :  { %v470_v20 = vmul.f32 %v897_v53, %v466_v16 }
 0x23b   :  { %473 = vst.msk [vmem:[#allocation11 + $0x8] sm:$0xff] %vm419_vm8, %v469_v17  ;;  %v467_v21 = vmul.f32 %v907_v12, %v463_v18  ;;  %867 = vmatmul.mubr.msk.f32.vlgmr.msra.gmra.mxu1 %vm419_vm8, %v469_v17 }
 0x23c   :  { %474 = vst.msk [vmem:[#allocation11 + $0x10] sm:$0xff] %vm419_vm8, %v470_v20  ;;  %872 = vmatmul.mubr.msk.f32.vlgmr.msra.gmra.mxu0 %vm419_vm8, %v470_v20  ;;  %875 = vmatpush3.msra.mxu1 %v479_v19 }
 0x23d   :  { %v471_v22 = vmul.f32 %v899_v56, %v467_v21  ;;  %876 = vmatprep.mubr.msk.f32.mxu1 %vm1047_vm0, %v1046_v0 }
 0x23f   :  { %475 = vst.msk [vmem:[#allocation11 + $0x18] sm:$0xff] %vm419_vm8, %v471_v22  ;;  %877 = vmatmul.mubr.msk.f32.vlgmr.msra.gmra.mxu1 %vm419_vm8, %v471_v22 }
 0x240   :  { %999 = shalt.err (!%p996_p10)
}
 0x241   :  { %799 = dma.vmem_to_hbm [thread:$0]  %s794_s3, 512, %s1171_s5, [#allocation12], %s1040_s23, %s1040_s23, %s1041_s24  }
 0x242   :  { %s1050_s18 = smov [#allocation10]  }
 0x243   :  { %s781_s19 = sshll.u32 %s1050_s18, 4  ;;  %s782_s19 = int_to_ptr.vmem [resolvable:$true] %s781_s19 }
 0x244   :  { %s1008_s5 = scalar_lea.vmem %s782_s19, 512  ;;  %p1013_p12 = scmp.lt.s32.totalorder %s782_s19, %s782_s19 }
 0x245   :  { %p1009_p11 = scmp.ne.s32.totalorder %s782_s19, %s1008_s5  ;;  %p1014_p13 = scmp.lt.s32.totalorder %s1008_s5, %s1008_s5 }
 0x247   :  { %p1015_p0 = por %p1014_p13, %p1013_p12 }
 0x249   :  { %p1016_p1 = pnand %p1015_p0, %p1009_p11 }
 0x2f7   :  { %v549_v0 = vpop.f32.mrf.mxu0 }
 0x2f8   :  { %772 = vst.msk [vmem:[#allocation10] sm:$0xff] %vm90_vm1, %v549_v0 }
 0x2f9   :  { %v863_v23 = vpop.f32.mrf.mxu0 }
 0x2fb   :  { %v622_v24 = vpop.f32.mrf.mxu1 }
 0x2fc   :  { %773 = vst.msk [vmem:[#allocation10 + $0x8] sm:$0xff] %vm90_vm1, %v622_v24  ;;  %v695_v25 = vpop.f32.mrf.mxu0 }
 0x2fd   :  { %774 = vst.msk [vmem:[#allocation10 + $0x10] sm:$0xff] %vm90_vm1, %v695_v25  ;;  %v868_v26 = vpop.f32.mrf.mxu1 }
 0x2fe   :  { %v873_v27 = vpop.f32.mrf.mxu0 }
 0x2ff   :  { %v768_v28 = vpop.f32.mrf.mxu1 }
 0x300   :  { %775 = vst.msk [vmem:[#allocation10 + $0x18] sm:$0xff] %vm90_vm1, %v768_v28 }
 0x301   :  { %v878_v29 = vpop.f32.mrf.mxu1 }
 0x302   :  { %1019 = shalt.err (!%p1016_p1)
}
 0x303   :  { %787 = dma.vmem_to_hbm [thread:$0]  %s782_s19, 512, %s1170_s4, [#allocation4], %s1040_s23, %s1040_s23, %s1041_s24  }
 0x304   :  { %1034 = dma.done.wait [#allocation4], 512  }
 0x305   :  { %1035 = vsyncadd [#allocation4], 4294966784 }
 0x306   :  { %1036 = dma.done.wait [#allocation12], 512  }
 0x307   :  { %1037 = vsyncadd [#allocation12], 4294966784 }
 0x308   :  { %806 = vsyncpa [#allocation3], 1 }
 0x309   :  { %807 = vsyncpa [#allocation6], 1 }
 0x30a   :  { %808 = vsyncpa [#allocation9], 1 }
 0x30b   :  { %809 = vsyncpa [#allocation4], 1 }
 0x30c   :  { %810 = vsyncpa [#allocation12], 1 }

</bundles_post_ra>
